<compile_context>
chip_gen: v5e
topology: v5e:2x2
jax: 0.10.0
libtpu: 0.0.40
codegen_flags: <defaults>
</compile_context>

<pallas_src>
import math
from functools import partial

import jax
import jax.numpy as jnp
from jax.experimental import pallas as pl
from jax.experimental.pallas import tpu as pltpu

HIDDEN = 128        # hidden width of the common layer (== lane width)
LANE = 128          # TPU lane count
BF16_SUBLANE = 16   # bf16 native sublane pack is (16, 128)


def _round_up(v, m):
    return ((v + m - 1) // m) * m


def _a2c_kernel(x_ref, w_ref, bh_ref, out_ref):
    # x_ref  : (TB, 128)     bf16 -- obs zero-padded along lanes, lane 127 == 1.0
    # w_ref  : (2, 128, 128) bf16 -- [0]=W1 (row 127 holds b1), [1]=[Wa|Wc]
    # bh_ref : (1, 128)      f32  -- heads bias [ba|bc], zero-padded
    # out_ref: (TB, 128)     f32  -- lane-dense combined head output
    h = jnp.dot(x_ref[...], w_ref[0], preferred_element_type=jnp.float32)
    h = jnp.maximum(h, 0.0)                                  # f32 ReLU (VPU)
    out = jnp.dot(h.astype(jnp.bfloat16), w_ref[1],
                  preferred_element_type=jnp.float32)        # fused actor+critic
    out_ref[...] = out + bh_ref[...]


def pack_params(params):
    """One-time parameter packing; call only when parameters change."""
    n_obs = params["w1"].shape[0]
    n_actions = params["wa"].shape[1]
    n_heads = n_actions + 1
    assert n_obs <= LANE - 1, "need one spare input lane for the folded bias"
    assert n_heads <= LANE

    # One contiguous weight buffer: [W1 (b1 folded into row 127) ; W_heads], bf16.
    w_packed = jnp.zeros((2, HIDDEN, LANE), jnp.bfloat16)
    w_packed = w_packed.at[0, :n_obs, :].set(params["w1"].astype(jnp.bfloat16))
    w_packed = w_packed.at[0, LANE - 1, :].set(
        params["b1"].reshape(-1).astype(jnp.bfloat16))
    w_heads = jnp.concatenate([params["wa"], params["wc"]], axis=1)  # (128, n_heads)
    w_packed = w_packed.at[1, :, :n_heads].set(w_heads.astype(jnp.bfloat16))

    # Heads bias only (b1 is folded), f32.
    b_heads = jnp.zeros((1, LANE), jnp.float32)
    b_heads = b_heads.at[0, :n_heads].set(
        jnp.concatenate([params["ba"].reshape(-1), params["bc"].reshape(-1)]))
    return w_packed, b_heads


@partial(jax.jit, static_argnames=("n_actions", "block_b"))
def a2c_forward(x, w_packed, b_heads, *, n_actions, block_b=512):
    """A2C forward pass: one Pallas call, batch grid for large rollouts.

    x        : (B, n_obs) float32
    w_packed : (2, 128, 128) bf16  from pack_params
    b_heads  : (1, 128)    f32     from pack_params
    returns  : (actor_logits (B, n_actions), value (B, 1))
    """
    B, n_obs = x.shape
    assert n_obs <= LANE - 1
    assert block_b % BF16_SUBLANE == 0

    if B <= block_b:
        tb = max(BF16_SUBLANE, _round_up(B, BF16_SUBLANE))   # bf16-pack aligned
        Bp = tb
    else:
        tb = block_b
        Bp = _round_up(B, tb)
    nb = Bp // tb

    # Pad obs into a lane-dense bf16 tile; lane 127 carries the constant-1
    # bias lane so b1 rides the first MXU pass.
    x_p = jnp.zeros((Bp, LANE), jnp.bfloat16)
    x_p = x_p.at[:B, :n_obs].set(x.astype(jnp.bfloat16))
    x_p = x_p.at[:B, LANE - 1].set(1.0)

    out = pl.pallas_call(
        _a2c_kernel,
        out_shape=jax.ShapeDtypeStruct((Bp, LANE), jnp.float32),
        grid=(nb,),
        in_specs=[
            pl.BlockSpec((tb, LANE), lambda i: (i, 0)),
            pl.BlockSpec((2, HIDDEN, LANE), lambda i: (0, 0, 0)),  # VMEM-resident
            pl.BlockSpec((1, LANE), lambda i: (0, 0)),             # VMEM-resident
        ],
        out_specs=pl.BlockSpec((tb, LANE), lambda i: (i, 0)),
        compiler_params=pltpu.CompilerParams(
            dimension_semantics=("parallel",)),                    # megacore on v7x
    )(x_p, w_packed, b_heads)

    actor = out[:B, :n_actions]
    critic = out[:B, n_actions:n_actions + 1]
    return actor, critic


def init_params(key, n_observations, n_actions, hidden=HIDDEN):
    """Deterministic init mimicking torch.nn.Linear default U[-1/sqrt(fan_in), +]."""
    keys = jax.random.split(key, 6)

    def lin(kw, kb, fan_in, fan_out):
        bound = 1.0 / math.sqrt(fan_in)
        w = jax.random.uniform(kw, (fan_in, fan_out), jnp.float32, -bound, bound)
        b = jax.random.uniform(kb, (1, fan_out), jnp.float32, -bound, bound)
        return w, b

    w1, b1 = lin(keys[0], keys[1], n_observations, hidden)
    wa, ba = lin(keys[2], keys[3], hidden, n_actions)
    wc, bc = lin(keys[4], keys[5], hidden, 1)
    return {"w1": w1, "b1": b1, "wa": wa, "ba": ba, "wc": wc, "bc": bc}


if __name__ == "__main__":
    # CartPole-like sizes: 4 observations, 2 actions, small batch.
    n_observations, n_actions, batch = 4, 2, 8

    key = jax.random.PRNGKey(0)
    k_params, k_x, k_big = jax.random.split(key, 3)
    params = init_params(k_params, n_observations, n_actions)

    # One-time packing (cached across forward calls).
    w_packed, b_heads = pack_params(params)
    w_packed, b_heads = jax.block_until_ready((w_packed, b_heads))

    # ---- small-batch (acting) path: single grid step ----
    x = jax.random.normal(k_x, (batch, n_observations), jnp.float32)
    actor_logits, value = jax.block_until_ready(
        a2c_forward(x, w_packed, b_heads, n_actions=n_actions))
    assert actor_logits.shape == (batch, n_actions)
    assert value.shape == (batch, 1)

    # Reference 1: mirrors the kernel's bf16-operand / f32-accum recipe (tight).
    xb = x.astype(jnp.bfloat16)
    w1b = params["w1"].astype(jnp.bfloat16)
    b1b = params["b1"].astype(jnp.bfloat16).astype(jnp.float32)
    whb = jnp.concatenate([params["wa"], params["wc"]], 1).astype(jnp.bfloat16)
    bh = jnp.concatenate([params["ba"], params["bc"]], 1)
    h_bf = jnp.maximum(
        jnp.dot(xb, w1b, preferred_element_type=jnp.float32) + b1b, 0.0)
    heads_bf = jnp.dot(h_bf.astype(jnp.bfloat16), whb,
                       preferred_element_type=jnp.float32) + bh
    assert jnp.allclose(actor_logits, heads_bf[:, :n_actions], atol=1e-3, rtol=1e-3)
    assert jnp.allclose(value, heads_bf[:, n_actions:n_actions + 1],
                        atol=1e-3, rtol=1e-3)

    # Reference 2: pure-f32 PyTorch semantics (loose tol for bf16 weights).
    h_f32 = jnp.maximum(x @ params["w1"] + params["b1"], 0.0)
    actor_ref = h_f32 @ params["wa"] + params["ba"]
    value_ref = h_f32 @ params["wc"] + params["bc"]
    assert jnp.allclose(actor_logits, actor_ref, atol=5e-2, rtol=5e-2)
    assert jnp.allclose(value, value_ref, atol=5e-2, rtol=5e-2)

    # ---- large-batch (rollout) path: exercises the parallel batch grid ----
    big_batch = 600
    x_big = jax.random.normal(k_big, (big_batch, n_observations), jnp.float32)
    a_big, v_big = jax.block_until_ready(
        a2c_forward(x_big, w_packed, b_heads, n_actions=n_actions, block_b=256))
    assert a_big.shape == (big_batch, n_actions)
    assert v_big.shape == (big_batch, 1)
    hb = jnp.maximum(x_big @ params["w1"] + params["b1"], 0.0)
    assert jnp.allclose(a_big, hb @ params["wa"] + params["ba"], atol=5e-2, rtol=5e-2)
    assert jnp.allclose(v_big, hb @ params["wc"] + params["bc"], atol=5e-2, rtol=5e-2)

    print("KERNEL_OK")
</pallas_src>

<mosaic_0001>
module attributes {stable_mosaic.version = 11 : i64} {
  func.func @_a2c_kernel(%arg0: i32, %arg1: memref<16x128xbf16, #tpu.memory_space<vmem>>, %arg2: memref<2x128x128xbf16, #tpu.memory_space<vmem>>, %arg3: memref<1x128xf32, #tpu.memory_space<vmem>>, %arg4: memref<16x128xf32, #tpu.memory_space<vmem>>) attributes {dimension_semantics = [#tpu.dimension_semantics<parallel>], iteration_bounds = array<i64: 1>, scalar_prefetch = 0 : i64, scratch_operands = 0 : i64, tpu.core_type = #tpu.core_type<tc>, window_params = [{transform_indices = @transform_0, window_bounds = array<i64: 16, 128>}, {pipeline_mode = #tpu.pipeline_mode<synchronous>, transform_indices = @transform_1, window_bounds = array<i64: 2, 128, 128>}, {pipeline_mode = #tpu.pipeline_mode<synchronous>, transform_indices = @transform_2, window_bounds = array<i64: 1, 128>}, {transform_indices = @transform_3, window_bounds = array<i64: 16, 128>}]} {
    %c0 = arith.constant 0 : index
    %c0_0 = arith.constant 0 : index
    %0 = vector.load %arg1[%c0, %c0_0] : memref<16x128xbf16, #tpu.memory_space<vmem>>, vector<16x128xbf16>
    %c0_1 = arith.constant 0 : index
    %c0_2 = arith.constant 0 : index
    %c0_3 = arith.constant 0 : index
    %1 = vector.load %arg2[%c0_1, %c0_2, %c0_3] : memref<2x128x128xbf16, #tpu.memory_space<vmem>>, vector<1x128x128xbf16>
    %2 = vector.shape_cast %1 : vector<1x128x128xbf16> to vector<128x128xbf16>
    %cst = arith.constant dense<0.000000e+00> : vector<16x128xf32>
    %3 = tpu.matmul %0, %2, %cst {dimension_numbers = #tpu.dot_dimension_numbers<[1], [0], [0], [1], [0, 0, 1, 1], [], []>} : vector<16x128xbf16>, vector<128x128xbf16>, vector<16x128xf32> -> vector<16x128xf32>
    %cst_4 = arith.constant 0.000000e+00 : f32
    %4 = vector.broadcast %cst_4 : f32 to vector<16x128xf32>
    %5 = arith.maximumf %3, %4 : vector<16x128xf32>
    %6 = arith.truncf %5 : vector<16x128xf32> to vector<16x128xbf16>
    %c1 = arith.constant 1 : index
    %c0_5 = arith.constant 0 : index
    %c0_6 = arith.constant 0 : index
    %7 = vector.load %arg2[%c1, %c0_5, %c0_6] : memref<2x128x128xbf16, #tpu.memory_space<vmem>>, vector<1x128x128xbf16>
    %8 = vector.shape_cast %7 : vector<1x128x128xbf16> to vector<128x128xbf16>
    %cst_7 = arith.constant dense<0.000000e+00> : vector<16x128xf32>
    %9 = tpu.matmul %6, %8, %cst_7 {dimension_numbers = #tpu.dot_dimension_numbers<[1], [0], [0], [1], [0, 0, 1, 1], [], []>} : vector<16x128xbf16>, vector<128x128xbf16>, vector<16x128xf32> -> vector<16x128xf32>
    %c0_8 = arith.constant 0 : index
    %c0_9 = arith.constant 0 : index
    %10 = vector.load %arg3[%c0_8, %c0_9] : memref<1x128xf32, #tpu.memory_space<vmem>>, vector<1x128xf32>
    %11 = vector.broadcast %10 : vector<1x128xf32> to vector<16x128xf32>
    %12 = arith.addf %9, %11 : vector<16x128xf32>
    %c0_10 = arith.constant 0 : index
    %c0_11 = arith.constant 0 : index
    %13 = vector.load %arg4[%c0_10, %c0_11] : memref<16x128xf32, #tpu.memory_space<vmem>>, vector<16x128xf32>
    tpu.vector_store %arg4[%c0_10, %c0_11], %12 {strides = array<i32>} : memref<16x128xf32, #tpu.memory_space<vmem>>, vector<16x128xf32>,
    return
  }
  func.func @transform_0(%arg0: i32) -> (i32, i32) {
    %c0_i32 = arith.constant 0 : i32
    %c0_i32_0 = arith.constant 0 : i32
    return %arg0, %c0_i32 : i32, i32
  }
  func.func @transform_1(%arg0: i32) -> (i32, i32, i32) {
    %c0_i32 = arith.constant 0 : i32
    %c0_i32_0 = arith.constant 0 : i32
    %c0_i32_1 = arith.constant 0 : i32
    %c0_i32_2 = arith.constant 0 : i32
    return %c0_i32, %c0_i32_0, %c0_i32_1 : i32, i32, i32
  }
  func.func @transform_2(%arg0: i32) -> (i32, i32) {
    %c0_i32 = arith.constant 0 : i32
    %c0_i32_0 = arith.constant 0 : i32
    %c0_i32_1 = arith.constant 0 : i32
    return %c0_i32, %c0_i32_0 : i32, i32
  }
  func.func @transform_3(%arg0: i32) -> (i32, i32) {
    %c0_i32 = arith.constant 0 : i32
    %c0_i32_0 = arith.constant 0 : i32
    return %arg0, %c0_i32 : i32, i32
  }
}

</mosaic_0001>

<bundles_post_ra>
// kernel: a2c_forward.1
= control target key start
LH: loop header
LB: loop body
LE: loop exit
PB: predicated region body
PF: predicated region fallthrough
CT: control target
= control target key end

     0   :  { %8 = vsyncpa [#allocation3], 0  ;;  %s324_s15 = smov [#allocation2]   ;;  %s325_s17 = smov 64   ;;  %s362_s0 = inlined_call_operand.vmem [shape: bf16[16,128], index: 0, kind: input, shape index: {}]   ;;  %s363_s1 = inlined_call_operand.hbm [shape: bf16[2,128,128], index: 1, kind: input, shape index: {}]   ;;  %s364_s2 = inlined_call_operand.vmem [shape: f32[1,128], index: 2, kind: input, shape index: {}]   ;;  %s365_s3 = inlined_call_operand.vmem [shape: f32[16,128], index: 3, kind: output, shape index: {}]  }
   0x1   :  { %s15_s14 = sshll.u32 %s363_s1, 4  ;;  %s17_s16 = sshll.u32 %s324_s15, 4  ;;  %s16_s14 = int_to_ptr.hbm [resolvable:$true] %s15_s14  ;;  %s18_s16 = int_to_ptr.vmem [resolvable:$true] %s17_s16 }
   0x2   :  { %s326_s18 = smov 4  }
   0x3   :  { %23 = dma.hbm_to_vmem [thread:$0]  %s16_s14, 2048, %s18_s16, [#allocation3], %s325_s17, %s325_s17, %s326_s18  }
   0x4   :  { %322 = dma.done.wait [#allocation3], 2048  }
   0x5   :  { %323 = vsyncadd [#allocation3], 4294965248  ;;  %v285_v0 = vld [vmem:[#allocation2 + $0x38] sm:$0xff]  ;;  %v284_v1 = vld [vmem:[#allocation2 + $0x30] sm:$0xff] }
   0x6   :  { %102 = vmatpush.bf16.msra.mxu0 %v285_v0  ;;  %v293_v2 = vld [vmem:[#allocation2 + $0x78] sm:$0xff]  ;;  %v292_v3 = vld [vmem:[#allocation2 + $0x70] sm:$0xff]  ;;  %v283_v4 = vld [vmem:[#allocation2 + $0x28] sm:$0xff] }
   0x7   :  { %188 = vmatpush.bf16.msra.mxu1 %v293_v2  ;;  %v291_v5 = vld [vmem:[#allocation2 + $0x68] sm:$0xff]  ;;  %v282_v6 = vld [vmem:[#allocation2 + $0x20] sm:$0xff]  ;;  %v281_v8 = vld [vmem:[#allocation2 + $0x18] sm:$0xff] }
   0x8   :  { %v290_v7 = vld [vmem:[#allocation2 + $0x60] sm:$0xff]  ;;  %v289_v9 = vld [vmem:[#allocation2 + $0x58] sm:$0xff]  ;;  %v280_v10 = vld [vmem:[#allocation2 + $0x10] sm:$0xff] }
   0x9   :  { %v279_v11 = vld [vmem:[#allocation2 + $0x8] sm:$0xff]  ;;  %v278_v12 = vld [vmem:[#allocation2] sm:$0xff]  ;;  %v288_v14 = vld [vmem:[#allocation2 + $0x50] sm:$0xff] }
   0xa   :  { %103 = vmatpush.bf16.msra.mxu0 %v284_v1  ;;  %v277_v13 = vld [vmem:[%s362_s0] sm:$0xff]  ;;  %v287_v15 = vld [vmem:[#allocation2 + $0x48] sm:$0xff] }
   0xb   :  { %189 = vmatpush.bf16.msra.mxu1 %v292_v3  ;;  %v286_v16 = vld [vmem:[#allocation2 + $0x40] sm:$0xff] }
   0xc   :  { %v297_v22 = vld [vmem:[%s364_s2] ss:$0 sm:$0xff] }
   0xe   :  { %104 = vmatpush.bf16.msra.mxu0 %v283_v4 }
   0xf   :  { %190 = vmatpush.bf16.msra.mxu1 %v291_v5 }
  0x12   :  { %105 = vmatpush.bf16.msra.mxu0 %v282_v6 }
  0x13   :  { %191 = vmatpush.bf16.msra.mxu1 %v290_v7 }
  0x16   :  { %106 = vmatpush.bf16.msra.mxu0 %v281_v8 }
  0x17   :  { %192 = vmatpush.bf16.msra.mxu1 %v289_v9 }
  0x1a   :  { %107 = vmatpush.bf16.msra.mxu0 %v280_v10 }
  0x1b   :  { %193 = vmatpush.bf16.msra.mxu1 %v288_v14 }
  0x1e   :  { %108 = vmatpush.bf16.msra.mxu0 %v279_v11 }
  0x1f   :  { %194 = vmatpush.bf16.msra.mxu1 %v287_v15 }
  0x22   :  { %109 = vmatpush.bf16.msra.mxu0 %v278_v12 }
  0x23   :  { %195 = vmatpush.bf16.msra.mxu1 %v286_v16 }
  0x25   :  { %110 = vmatmul.bf16.vlgmr.msra.gmra.mxu0 %v277_v13 }
  0xa2   :  { %v111_v17 = vpop.f32.mrf.mxu0 }
  0xa3   :  { %v116_v19 = vmax.f32 %v111_v17, 0.0 }
  0xaa   :  { %v113_v18 = vpop.f32.mrf.mxu0 }
  0xab   :  { %v117_v20 = vmax.f32 %v113_v18, 0.0 }
  0xad   :  { %v118_v21 = vpack.c.bf16 %v117_v20, %v116_v19 }
  0xaf   :  { %196 = vmatmul.bf16.vlgmr.msra.gmra.mxu1 %v118_v21 }
 0x12c   :  { %v197_v23 = vpop.f32.mrf.mxu1 }
 0x12d   :  { %v198_v24 = vadd.f32 %v297_v22, %v197_v23 }
 0x12f   :  { %202 = vst [vmem:[%s365_s3] sm:$0xff] %v198_v24 }
 0x134   :  { %v199_v25 = vpop.f32.mrf.mxu1 }
 0x135   :  { %v200_v26 = vadd.f32 %v297_v22, %v199_v25 }
 0x137   :  { %203 = vst [vmem:[%s365_s3 + $0x8] sm:$0xff] %v200_v26 }
 0x138   :  { %208 = vsyncpa [#allocation3], 1 }

</bundles_post_ra>
